<compile_context>
chip_gen: v5e
topology: v5e:2x2
jax: 0.10.0
libtpu: 0.0.40
codegen_flags: <defaults>
</compile_context>

<pallas_src>
import functools

import jax
import jax.numpy as jnp
from jax.experimental import pallas as pl
from jax.experimental.pallas import tpu as pltpu


# ----------------------------------------------------------------------------- kernel
def _fused_kernel(xv_ref, dw_ref, db_ref,
                  w1_ref, b1_ref, w2_ref, b2_ref, w3_ref, b3_ref,
                  taps_ref, o_ref, *, n_img, cin, cout, pix):
    relu = lambda t: jnp.maximum(t, 0.0)
    nc = n_img * cin

    # dense branch:  v2 = relu(x1 @ W_d.T + b_d)  -> (Cout, 1), pure VPU (no MXU)
    v1 = (dw_ref[:, 0:1] * xv_ref[0:1, 0:1]
          + dw_ref[:, 1:2] * xv_ref[0:1, 1:2]
          + db_ref[...])
    v2 = relu(v1)                                       # (Cout, 1)
    v2b = jnp.broadcast_to(v2, (cout, pix))             # hoisted broadcast, reused below

    # tap row layout in taps_ref: row = tap * (N*C) + n * C + c
    #   taps 0..3 : conv3's (di, dj) in {(0,0),(0,1),(1,0),(1,1)}; tap 0 == conv1 crop
    #   tap  4    : conv2's stride-3 crop
    def conv_1x1(w_ref, b_ref, tap, n):
        acc = b_ref[...]                                # (Cout, 1) -> broadcasts to (Cout, pix)
        for c in range(cin):
            row = tap * nc + n * cin + c
            acc = acc + w_ref[:, c:c + 1] * taps_ref[row:row + 1, :]
        return acc

    for n in range(n_img):                              # N is tiny; unrolled at trace time
        c1 = conv_1x1(w1_ref, b1_ref, 0, n)             # conv1: 1x1, stride 1
        c2 = conv_1x1(w2_ref, b2_ref, 4, n)             # conv2: 1x1, stride 3

        c3 = b3_ref[...]                                # conv3: 2x2, stride 1
        for tap in range(4):
            for c in range(cin):
                row = tap * nc + n * cin + c
                col = tap * cin + c
                c3 = c3 + w3_ref[:, col:col + 1] * taps_ref[row:row + 1, :]

        v3 = c1 + v2b
        m23 = jnp.maximum(v2b, v3)                      # computed once, reused
        v4 = c2 + m23
        # TODO(synk): torch.max(v2, v3, v4) with three tensors is not a valid torch call;
        # reinterpreted here as an elementwise maximum over the three tensors.
        v5 = jnp.maximum(m23, v4)
        v6 = relu(v5)
        v7 = c3 + v6
        v8 = relu(v7)
        o_ref[n] = jnp.maximum(v5, v8)                  # (Cout, Hc*Wc), NCHW-ready


# ----------------------------------------------------------------------------- wrapper
@jax.jit
def forward(x_vec, x_img_nchw, params):
    """x_vec: (1, 2) f32, x_img_nchw: (N, 3, H, W) f32.  Returns (N, 10, Hc, Wc) f32."""
    dw, db, w1, b1, w2, b2, w3, b3 = params
    N, C, H, W = x_img_nchw.shape
    Cout = dw.shape[0]

    # output spatial extents of each conv (PyTorch formula), common crop
    H1, W1 = H + 2, W + 2                           # conv1: k=1, s=1, p=1
    H2, W2 = (H + 1) // 3 + 1, (W + 1) // 3 + 1     # conv2: k=1, s=3, p=1
    H3, W3 = H + 1, W + 1                           # conv3: k=2, s=1, p=1
    Hc, Wc = min(H1, H2, H3), min(W1, W2, W3)
    pix = Hc * Wc

    # pad once; build every conv tap as a shifted/strided view, stacked in one fused op
    xpad = jnp.pad(x_img_nchw, ((0, 0), (0, 0), (1, 1), (1, 1)))    # (N, C, H+2, W+2)
    t00 = xpad[:, :, 0:Hc,       0:Wc]
    t01 = xpad[:, :, 0:Hc,       1:1 + Wc]
    t10 = xpad[:, :, 1:1 + Hc,   0:Wc]
    t11 = xpad[:, :, 1:1 + Hc,   1:1 + Wc]
    ts  = xpad[:, :, 0:3 * Hc:3, 0:3 * Wc:3]
    taps = jnp.stack([t00, t01, t10, t11, ts], axis=0).reshape(5 * N * C, pix)

    # weights: torch layouts -> (Cout, K) columns with Cout on the sublane axis
    w1m = w1.reshape(Cout, C)                                       # (10, 3)
    w2m = w2.reshape(Cout, C)
    w3m = jnp.transpose(w3, (0, 2, 3, 1)).reshape(Cout, 4 * C)      # col = tap*C + c
    db2 = db.reshape(Cout, 1)
    b1m = b1.reshape(Cout, 1)
    b2m = b2.reshape(Cout, 1)
    b3m = b3.reshape(Cout, 1)

    kern = functools.partial(_fused_kernel, n_img=N, cin=C, cout=Cout, pix=pix)
    vmem = pl.BlockSpec(memory_space=pltpu.MemorySpace.VMEM)

    out_flat = pl.pallas_call(
        kern,
        out_shape=jax.ShapeDtypeStruct((N, Cout, pix), jnp.float32),
        in_specs=[vmem] * 10,
        out_specs=vmem,
    )(x_vec, dw, db2, w1m, b1m, w2m, b2m, w3m, b3m, taps)

    return out_flat.reshape(N, Cout, Hc, Wc)            # pure reshape, already NCHW


# ----------------------------------------------------------------------------- reference
def reference(x_vec, x_img, params):
    dw, db, w1, b1, w2, b2, w3, b3 = params
    relu = lambda t: jnp.maximum(t, 0.0)

    def conv(x, w, b, stride, pad):
        y = jax.lax.conv_general_dilated(
            x, w, (stride, stride), [(pad, pad), (pad, pad)],
            dimension_numbers=('NCHW', 'OIHW', 'NCHW'))
        return y + b[None, :, None, None]

    N, C, H, W = x_img.shape
    Hc = min(H + 2, (H + 1) // 3 + 1, H + 1)
    Wc = min(W + 2, (W + 1) // 3 + 1, W + 1)
    crop = lambda y: y[:, :, :Hc, :Wc]

    v2 = relu(x_vec @ dw.T + db)                     # (1, 10)
    v2b = v2.reshape(1, 10, 1, 1)

    c1 = crop(conv(x_img, w1, b1, 1, 1))
    c2 = crop(conv(x_img, w2, b2, 3, 1))
    c3 = crop(conv(x_img, w3, b3, 1, 1))

    v3 = c1 + v2b
    v4 = c2 + jnp.maximum(v2b, v3)
    v5 = jnp.maximum(jnp.maximum(jnp.broadcast_to(v2b, v3.shape), v3), v4)
    v6 = relu(v5)
    v7 = c3 + v6
    v8 = relu(v7)
    return jnp.maximum(v5, v8)


# ----------------------------------------------------------------------------- main
if __name__ == "__main__":
    key = jax.random.PRNGKey(0)
    ks = jax.random.split(key, 10)

    x_vec = jax.random.normal(ks[0], (1, 2), jnp.float32)
    x_img = jax.random.normal(ks[1], (2, 3, 16, 16), jnp.float32)

    dw = jax.random.normal(ks[2], (10, 2), jnp.float32) * 0.5
    db = jax.random.normal(ks[3], (10,), jnp.float32) * 0.1
    w1 = jax.random.normal(ks[4], (10, 3, 1, 1), jnp.float32) * 0.3
    b1 = jax.random.normal(ks[5], (10,), jnp.float32) * 0.1
    w2 = jax.random.normal(ks[6], (10, 3, 1, 1), jnp.float32) * 0.3
    b2 = jax.random.normal(ks[7], (10,), jnp.float32) * 0.1
    w3 = jax.random.normal(ks[8], (10, 3, 2, 2), jnp.float32) * 0.3
    b3 = jax.random.normal(ks[9], (10,), jnp.float32) * 0.1
    params = (dw, db, w1, b1, w2, b2, w3, b3)

    out = forward(x_vec, x_img, params)
    out = jax.block_until_ready(out)

    ref = reference(x_vec, x_img, params)
    assert out.shape == ref.shape, (out.shape, ref.shape)
    if not jnp.allclose(out, ref, rtol=1e-3, atol=1e-3):
        raise SystemExit("Pallas kernel does not match JAX reference")

    print("KERNEL_OK")
</pallas_src>

<mosaic_0001>
module attributes {stable_mosaic.version = 11 : i64} {
  func.func @_fused_kernel(%arg0: memref<1x2xf32, #tpu.memory_space<vmem>>, %arg1: memref<10x2xf32, #tpu.memory_space<vmem>>, %arg2: memref<10x1xf32, #tpu.memory_space<vmem>>, %arg3: memref<10x3xf32, #tpu.memory_space<vmem>>, %arg4: memref<10x1xf32, #tpu.memory_space<vmem>>, %arg5: memref<10x3xf32, #tpu.memory_space<vmem>>, %arg6: memref<10x1xf32, #tpu.memory_space<vmem>>, %arg7: memref<10x12xf32, #tpu.memory_space<vmem>>, %arg8: memref<10x1xf32, #tpu.memory_space<vmem>>, %arg9: memref<30x36xf32, #tpu.memory_space<vmem>>, %arg10: memref<2x10x36xf32, #tpu.memory_space<vmem>>) attributes {dimension_semantics = [], scalar_prefetch = 0 : i64, scratch_operands = 0 : i64, tpu.core_type = #tpu.core_type<tc>} {
    %c0 = arith.constant 0 : index
    %c0_0 = arith.constant 0 : index
    %0 = vector.load %arg1[%c0, %c0_0] : memref<10x2xf32, #tpu.memory_space<vmem>>, vector<10x1xf32>
    %c0_1 = arith.constant 0 : index
    %c0_2 = arith.constant 0 : index
    %1 = vector.load %arg0[%c0_1, %c0_2] : memref<1x2xf32, #tpu.memory_space<vmem>>, vector<1x1xf32>
    %2 = vector.broadcast %1 : vector<1x1xf32> to vector<10x1xf32>
    %3 = arith.mulf %0, %2 : vector<10x1xf32>
    %c0_3 = arith.constant 0 : index
    %c1 = arith.constant 1 : index
    %4 = vector.load %arg1[%c0_3, %c1] : memref<10x2xf32, #tpu.memory_space<vmem>>, vector<10x1xf32>
    %c0_4 = arith.constant 0 : index
    %c1_5 = arith.constant 1 : index
    %5 = vector.load %arg0[%c0_4, %c1_5] : memref<1x2xf32, #tpu.memory_space<vmem>>, vector<1x1xf32>
    %6 = vector.broadcast %5 : vector<1x1xf32> to vector<10x1xf32>
    %7 = arith.mulf %4, %6 : vector<10x1xf32>
    %8 = arith.addf %3, %7 : vector<10x1xf32>
    %c0_6 = arith.constant 0 : index
    %c0_7 = arith.constant 0 : index
    %9 = vector.load %arg2[%c0_6, %c0_7] : memref<10x1xf32, #tpu.memory_space<vmem>>, vector<10x1xf32>
    %10 = arith.addf %8, %9 : vector<10x1xf32>
    %cst = arith.constant 0.000000e+00 : f32
    %11 = vector.broadcast %cst : f32 to vector<10x1xf32>
    %12 = arith.maximumf %10, %11 : vector<10x1xf32>
    %13 = vector.shape_cast %12 : vector<10x1xf32> to vector<10x1xf32>
    %14 = vector.broadcast %13 : vector<10x1xf32> to vector<10x36xf32>
    %c0_8 = arith.constant 0 : index
    %c0_9 = arith.constant 0 : index
    %15 = vector.load %arg4[%c0_8, %c0_9] : memref<10x1xf32, #tpu.memory_space<vmem>>, vector<10x1xf32>
    %c0_10 = arith.constant 0 : index
    %c0_11 = arith.constant 0 : index
    %16 = vector.load %arg3[%c0_10, %c0_11] : memref<10x3xf32, #tpu.memory_space<vmem>>, vector<10x1xf32>
    %c0_12 = arith.constant 0 : index
    %c0_13 = arith.constant 0 : index
    %17 = vector.load %arg9[%c0_12, %c0_13] : memref<30x36xf32, #tpu.memory_space<vmem>>, vector<1x36xf32>
    %18 = vector.broadcast %16 : vector<10x1xf32> to vector<10x36xf32>
    %19 = vector.broadcast %17 : vector<1x36xf32> to vector<10x36xf32>
    %20 = arith.mulf %18, %19 : vector<10x36xf32>
    %21 = vector.broadcast %15 : vector<10x1xf32> to vector<10x36xf32>
    %22 = arith.addf %21, %20 : vector<10x36xf32>
    %c0_14 = arith.constant 0 : index
    %c1_15 = arith.constant 1 : index
    %23 = vector.load %arg3[%c0_14, %c1_15] : memref<10x3xf32, #tpu.memory_space<vmem>>, vector<10x1xf32>
    %c1_16 = arith.constant 1 : index
    %c0_17 = arith.constant 0 : index
    %24 = vector.load %arg9[%c1_16, %c0_17] : memref<30x36xf32, #tpu.memory_space<vmem>>, vector<1x36xf32>
    %25 = vector.broadcast %23 : vector<10x1xf32> to vector<10x36xf32>
    %26 = vector.broadcast %24 : vector<1x36xf32> to vector<10x36xf32>
    %27 = arith.mulf %25, %26 : vector<10x36xf32>
    %28 = arith.addf %22, %27 : vector<10x36xf32>
    %c0_18 = arith.constant 0 : index
    %c2 = arith.constant 2 : index
    %29 = vector.load %arg3[%c0_18, %c2] : memref<10x3xf32, #tpu.memory_space<vmem>>, vector<10x1xf32>
    %c2_19 = arith.constant 2 : index
    %c0_20 = arith.constant 0 : index
    %30 = vector.load %arg9[%c2_19, %c0_20] : memref<30x36xf32, #tpu.memory_space<vmem>>, vector<1x36xf32>
    %31 = vector.broadcast %29 : vector<10x1xf32> to vector<10x36xf32>
    %32 = vector.broadcast %30 : vector<1x36xf32> to vector<10x36xf32>
    %33 = arith.mulf %31, %32 : vector<10x36xf32>
    %34 = arith.addf %28, %33 : vector<10x36xf32>
    %c0_21 = arith.constant 0 : index
    %c0_22 = arith.constant 0 : index
    %35 = vector.load %arg6[%c0_21, %c0_22] : memref<10x1xf32, #tpu.memory_space<vmem>>, vector<10x1xf32>
    %c0_23 = arith.constant 0 : index
    %c0_24 = arith.constant 0 : index
    %36 = vector.load %arg5[%c0_23, %c0_24] : memref<10x3xf32, #tpu.memory_space<vmem>>, vector<10x1xf32>
    %c24 = arith.constant 24 : index
    %c0_25 = arith.constant 0 : index
    %37 = vector.load %arg9[%c24, %c0_25] : memref<30x36xf32, #tpu.memory_space<vmem>>, vector<1x36xf32>
    %38 = vector.broadcast %36 : vector<10x1xf32> to vector<10x36xf32>
    %39 = vector.broadcast %37 : vector<1x36xf32> to vector<10x36xf32>
    %40 = arith.mulf %38, %39 : vector<10x36xf32>
    %41 = vector.broadcast %35 : vector<10x1xf32> to vector<10x36xf32>
    %42 = arith.addf %41, %40 : vector<10x36xf32>
    %c0_26 = arith.constant 0 : index
    %c1_27 = arith.constant 1 : index
    %43 = vector.load %arg5[%c0_26, %c1_27] : memref<10x3xf32, #tpu.memory_space<vmem>>, vector<10x1xf32>
    %c25 = arith.constant 25 : index
    %c0_28 = arith.constant 0 : index
    %44 = vector.load %arg9[%c25, %c0_28] : memref<30x36xf32, #tpu.memory_space<vmem>>, vector<1x36xf32>
    %45 = vector.broadcast %43 : vector<10x1xf32> to vector<10x36xf32>
    %46 = vector.broadcast %44 : vector<1x36xf32> to vector<10x36xf32>
    %47 = arith.mulf %45, %46 : vector<10x36xf32>
    %48 = arith.addf %42, %47 : vector<10x36xf32>
    %c0_29 = arith.constant 0 : index
    %c2_30 = arith.constant 2 : index
    %49 = vector.load %arg5[%c0_29, %c2_30] : memref<10x3xf32, #tpu.memory_space<vmem>>, vector<10x1xf32>
    %c26 = arith.constant 26 : index
    %c0_31 = arith.constant 0 : index
    %50 = vector.load %arg9[%c26, %c0_31] : memref<30x36xf32, #tpu.memory_space<vmem>>, vector<1x36xf32>
    %51 = vector.broadcast %49 : vector<10x1xf32> to vector<10x36xf32>
    %52 = vector.broadcast %50 : vector<1x36xf32> to vector<10x36xf32>
    %53 = arith.mulf %51, %52 : vector<10x36xf32>
    %54 = arith.addf %48, %53 : vector<10x36xf32>
    %c0_32 = arith.constant 0 : index
    %c0_33 = arith.constant 0 : index
    %55 = vector.load %arg8[%c0_32, %c0_33] : memref<10x1xf32, #tpu.memory_space<vmem>>, vector<10x1xf32>
    %c0_34 = arith.constant 0 : index
    %c0_35 = arith.constant 0 : index
    %56 = vector.load %arg7[%c0_34, %c0_35] : memref<10x12xf32, #tpu.memory_space<vmem>>, vector<10x1xf32>
    %c0_36 = arith.constant 0 : index
    %c0_37 = arith.constant 0 : index
    %57 = vector.load %arg9[%c0_36, %c0_37] : memref<30x36xf32, #tpu.memory_space<vmem>>, vector<1x36xf32>
    %58 = vector.broadcast %56 : vector<10x1xf32> to vector<10x36xf32>
    %59 = vector.broadcast %57 : vector<1x36xf32> to vector<10x36xf32>
    %60 = arith.mulf %58, %59 : vector<10x36xf32>
    %61 = vector.broadcast %55 : vector<10x1xf32> to vector<10x36xf32>
    %62 = arith.addf %61, %60 : vector<10x36xf32>
    %c0_38 = arith.constant 0 : index
    %c1_39 = arith.constant 1 : index
    %63 = vector.load %arg7[%c0_38, %c1_39] : memref<10x12xf32, #tpu.memory_space<vmem>>, vector<10x1xf32>
    %c1_40 = arith.constant 1 : index
    %c0_41 = arith.constant 0 : index
    %64 = vector.load %arg9[%c1_40, %c0_41] : memref<30x36xf32, #tpu.memory_space<vmem>>, vector<1x36xf32>
    %65 = vector.broadcast %63 : vector<10x1xf32> to vector<10x36xf32>
    %66 = vector.broadcast %64 : vector<1x36xf32> to vector<10x36xf32>
    %67 = arith.mulf %65, %66 : vector<10x36xf32>
    %68 = arith.addf %62, %67 : vector<10x36xf32>
    %c0_42 = arith.constant 0 : index
    %c2_43 = arith.constant 2 : index
    %69 = vector.load %arg7[%c0_42, %c2_43] : memref<10x12xf32, #tpu.memory_space<vmem>>, vector<10x1xf32>
    %c2_44 = arith.constant 2 : index
    %c0_45 = arith.constant 0 : index
    %70 = vector.load %arg9[%c2_44, %c0_45] : memref<30x36xf32, #tpu.memory_space<vmem>>, vector<1x36xf32>
    %71 = vector.broadcast %69 : vector<10x1xf32> to vector<10x36xf32>
    %72 = vector.broadcast %70 : vector<1x36xf32> to vector<10x36xf32>
    %73 = arith.mulf %71, %72 : vector<10x36xf32>
    %74 = arith.addf %68, %73 : vector<10x36xf32>
    %c0_46 = arith.constant 0 : index
    %c3 = arith.constant 3 : index
    %75 = vector.load %arg7[%c0_46, %c3] : memref<10x12xf32, #tpu.memory_space<vmem>>, vector<10x1xf32>
    %c6 = arith.constant 6 : index
    %c0_47 = arith.constant 0 : index
    %76 = vector.load %arg9[%c6, %c0_47] : memref<30x36xf32, #tpu.memory_space<vmem>>, vector<1x36xf32>
    %77 = vector.broadcast %75 : vector<10x1xf32> to vector<10x36xf32>
    %78 = vector.broadcast %76 : vector<1x36xf32> to vector<10x36xf32>
    %79 = arith.mulf %77, %78 : vector<10x36xf32>
    %80 = arith.addf %74, %79 : vector<10x36xf32>
    %c0_48 = arith.constant 0 : index
    %c4 = arith.constant 4 : index
    %81 = vector.load %arg7[%c0_48, %c4] : memref<10x12xf32, #tpu.memory_space<vmem>>, vector<10x1xf32>
    %c7 = arith.constant 7 : index
    %c0_49 = arith.constant 0 : index
    %82 = vector.load %arg9[%c7, %c0_49] : memref<30x36xf32, #tpu.memory_space<vmem>>, vector<1x36xf32>
    %83 = vector.broadcast %81 : vector<10x1xf32> to vector<10x36xf32>
    %84 = vector.broadcast %82 : vector<1x36xf32> to vector<10x36xf32>
    %85 = arith.mulf %83, %84 : vector<10x36xf32>
    %86 = arith.addf %80, %85 : vector<10x36xf32>
    %c0_50 = arith.constant 0 : index
    %c5 = arith.constant 5 : index
    %87 = vector.load %arg7[%c0_50, %c5] : memref<10x12xf32, #tpu.memory_space<vmem>>, vector<10x1xf32>
    %c8 = arith.constant 8 : index
    %c0_51 = arith.constant 0 : index
    %88 = vector.load %arg9[%c8, %c0_51] : memref<30x36xf32, #tpu.memory_space<vmem>>, vector<1x36xf32>
    %89 = vector.broadcast %87 : vector<10x1xf32> to vector<10x36xf32>
    %90 = vector.broadcast %88 : vector<1x36xf32> to vector<10x36xf32>
    %91 = arith.mulf %89, %90 : vector<10x36xf32>
    %92 = arith.addf %86, %91 : vector<10x36xf32>
    %c0_52 = arith.constant 0 : index
    %c6_53 = arith.constant 6 : index
    %93 = vector.load %arg7[%c0_52, %c6_53] : memref<10x12xf32, #tpu.memory_space<vmem>>, vector<10x1xf32>
    %c12 = arith.constant 12 : index
    %c0_54 = arith.constant 0 : index
    %94 = vector.load %arg9[%c12, %c0_54] : memref<30x36xf32, #tpu.memory_space<vmem>>, vector<1x36xf32>
    %95 = vector.broadcast %93 : vector<10x1xf32> to vector<10x36xf32>
    %96 = vector.broadcast %94 : vector<1x36xf32> to vector<10x36xf32>
    %97 = arith.mulf %95, %96 : vector<10x36xf32>
    %98 = arith.addf %92, %97 : vector<10x36xf32>
    %c0_55 = arith.constant 0 : index
    %c7_56 = arith.constant 7 : index
    %99 = vector.load %arg7[%c0_55, %c7_56] : memref<10x12xf32, #tpu.memory_space<vmem>>, vector<10x1xf32>
    %c13 = arith.constant 13 : index
    %c0_57 = arith.constant 0 : index
    %100 = vector.load %arg9[%c13, %c0_57] : memref<30x36xf32, #tpu.memory_space<vmem>>, vector<1x36xf32>
    %101 = vector.broadcast %99 : vector<10x1xf32> to vector<10x36xf32>
    %102 = vector.broadcast %100 : vector<1x36xf32> to vector<10x36xf32>
    %103 = arith.mulf %101, %102 : vector<10x36xf32>
    %104 = arith.addf %98, %103 : vector<10x36xf32>
    %c0_58 = arith.constant 0 : index
    %c8_59 = arith.constant 8 : index
    %105 = vector.load %arg7[%c0_58, %c8_59] : memref<10x12xf32, #tpu.memory_space<vmem>>, vector<10x1xf32>
    %c14 = arith.constant 14 : index
    %c0_60 = arith.constant 0 : index
    %106 = vector.load %arg9[%c14, %c0_60] : memref<30x36xf32, #tpu.memory_space<vmem>>, vector<1x36xf32>
    %107 = vector.broadcast %105 : vector<10x1xf32> to vector<10x36xf32>
    %108 = vector.broadcast %106 : vector<1x36xf32> to vector<10x36xf32>
    %109 = arith.mulf %107, %108 : vector<10x36xf32>
    %110 = arith.addf %104, %109 : vector<10x36xf32>
    %c0_61 = arith.constant 0 : index
    %c9 = arith.constant 9 : index
    %111 = vector.load %arg7[%c0_61, %c9] : memref<10x12xf32, #tpu.memory_space<vmem>>, vector<10x1xf32>
    %c18 = arith.constant 18 : index
    %c0_62 = arith.constant 0 : index
    %112 = vector.load %arg9[%c18, %c0_62] : memref<30x36xf32, #tpu.memory_space<vmem>>, vector<1x36xf32>
    %113 = vector.broadcast %111 : vector<10x1xf32> to vector<10x36xf32>
    %114 = vector.broadcast %112 : vector<1x36xf32> to vector<10x36xf32>
    %115 = arith.mulf %113, %114 : vector<10x36xf32>
    %116 = arith.addf %110, %115 : vector<10x36xf32>
    %c0_63 = arith.constant 0 : index
    %c10 = arith.constant 10 : index
    %117 = vector.load %arg7[%c0_63, %c10] : memref<10x12xf32, #tpu.memory_space<vmem>>, vector<10x1xf32>
    %c19 = arith.constant 19 : index
    %c0_64 = arith.constant 0 : index
    %118 = vector.load %arg9[%c19, %c0_64] : memref<30x36xf32, #tpu.memory_space<vmem>>, vector<1x36xf32>
    %119 = vector.broadcast %117 : vector<10x1xf32> to vector<10x36xf32>
    %120 = vector.broadcast %118 : vector<1x36xf32> to vector<10x36xf32>
    %121 = arith.mulf %119, %120 : vector<10x36xf32>
    %122 = arith.addf %116, %121 : vector<10x36xf32>
    %c0_65 = arith.constant 0 : index
    %c11 = arith.constant 11 : index
    %123 = vector.load %arg7[%c0_65, %c11] : memref<10x12xf32, #tpu.memory_space<vmem>>, vector<10x1xf32>
    %c20 = arith.constant 20 : index
    %c0_66 = arith.constant 0 : index
    %124 = vector.load %arg9[%c20, %c0_66] : memref<30x36xf32, #tpu.memory_space<vmem>>, vector<1x36xf32>
    %125 = vector.broadcast %123 : vector<10x1xf32> to vector<10x36xf32>
    %126 = vector.broadcast %124 : vector<1x36xf32> to vector<10x36xf32>
    %127 = arith.mulf %125, %126 : vector<10x36xf32>
    %128 = arith.addf %122, %127 : vector<10x36xf32>
    %129 = arith.addf %34, %14 : vector<10x36xf32>
    %130 = arith.maximumf %14, %129 : vector<10x36xf32>
    %131 = arith.addf %54, %130 : vector<10x36xf32>
    %132 = arith.maximumf %130, %131 : vector<10x36xf32>
    %cst_67 = arith.constant 0.000000e+00 : f32
    %133 = vector.broadcast %cst_67 : f32 to vector<10x36xf32>
    %134 = arith.maximumf %132, %133 : vector<10x36xf32>
    %135 = arith.addf %128, %134 : vector<10x36xf32>
    %cst_68 = arith.constant 0.000000e+00 : f32
    %136 = vector.broadcast %cst_68 : f32 to vector<10x36xf32>
    %137 = arith.maximumf %135, %136 : vector<10x36xf32>
    %138 = arith.maximumf %132, %137 : vector<10x36xf32>
    %c0_69 = arith.constant 0 : index
    %c0_70 = arith.constant 0 : index
    %c0_71 = arith.constant 0 : index
    %139 = vector.load %arg10[%c0_69, %c0_70, %c0_71] : memref<2x10x36xf32, #tpu.memory_space<vmem>>, vector<1x10x36xf32>
    %140 = vector.shape_cast %139 : vector<1x10x36xf32> to vector<10x36xf32>
    %141 = vector.shape_cast %138 : vector<10x36xf32> to vector<1x10x36xf32>
    tpu.vector_store %arg10[%c0_69, %c0_70, %c0_71], %141 {strides = array<i32>} : memref<2x10x36xf32, #tpu.memory_space<vmem>>, vector<1x10x36xf32>,
    %c0_72 = arith.constant 0 : index
    %c0_73 = arith.constant 0 : index
    %142 = vector.load %arg4[%c0_72, %c0_73] : memref<10x1xf32, #tpu.memory_space<vmem>>, vector<10x1xf32>
    %c0_74 = arith.constant 0 : index
    %c0_75 = arith.constant 0 : index
    %143 = vector.load %arg3[%c0_74, %c0_75] : memref<10x3xf32, #tpu.memory_space<vmem>>, vector<10x1xf32>
    %c3_76 = arith.constant 3 : index
    %c0_77 = arith.constant 0 : index
    %144 = vector.load %arg9[%c3_76, %c0_77] : memref<30x36xf32, #tpu.memory_space<vmem>>, vector<1x36xf32>
    %145 = vector.broadcast %143 : vector<10x1xf32> to vector<10x36xf32>
    %146 = vector.broadcast %144 : vector<1x36xf32> to vector<10x36xf32>
    %147 = arith.mulf %145, %146 : vector<10x36xf32>
    %148 = vector.broadcast %142 : vector<10x1xf32> to vector<10x36xf32>
    %149 = arith.addf %148, %147 : vector<10x36xf32>
    %c0_78 = arith.constant 0 : index
    %c1_79 = arith.constant 1 : index
    %150 = vector.load %arg3[%c0_78, %c1_79] : memref<10x3xf32, #tpu.memory_space<vmem>>, vector<10x1xf32>
    %c4_80 = arith.constant 4 : index
    %c0_81 = arith.constant 0 : index
    %151 = vector.load %arg9[%c4_80, %c0_81] : memref<30x36xf32, #tpu.memory_space<vmem>>, vector<1x36xf32>
    %152 = vector.broadcast %150 : vector<10x1xf32> to vector<10x36xf32>
    %153 = vector.broadcast %151 : vector<1x36xf32> to vector<10x36xf32>
    %154 = arith.mulf %152, %153 : vector<10x36xf32>
    %155 = arith.addf %149, %154 : vector<10x36xf32>
    %c0_82 = arith.constant 0 : index
    %c2_83 = arith.constant 2 : index
    %156 = vector.load %arg3[%c0_82, %c2_83] : memref<10x3xf32, #tpu.memory_space<vmem>>, vector<10x1xf32>
    %c5_84 = arith.constant 5 : index
    %c0_85 = arith.constant 0 : index
    %157 = vector.load %arg9[%c5_84, %c0_85] : memref<30x36xf32, #tpu.memory_space<vmem>>, vector<1x36xf32>
    %158 = vector.broadcast %156 : vector<10x1xf32> to vector<10x36xf32>
    %159 = vector.broadcast %157 : vector<1x36xf32> to vector<10x36xf32>
    %160 = arith.mulf %158, %159 : vector<10x36xf32>
    %161 = arith.addf %155, %160 : vector<10x36xf32>
    %c0_86 = arith.constant 0 : index
    %c0_87 = arith.constant 0 : index
    %162 = vector.load %arg6[%c0_86, %c0_87] : memref<10x1xf32, #tpu.memory_space<vmem>>, vector<10x1xf32>
    %c0_88 = arith.constant 0 : index
    %c0_89 = arith.constant 0 : index
    %163 = vector.load %arg5[%c0_88, %c0_89] : memref<10x3xf32, #tpu.memory_space<vmem>>, vector<10x1xf32>
    %c27 = arith.constant 27 : index
    %c0_90 = arith.constant 0 : index
    %164 = vector.load %arg9[%c27, %c0_90] : memref<30x36xf32, #tpu.memory_space<vmem>>, vector<1x36xf32>
    %165 = vector.broadcast %163 : vector<10x1xf32> to vector<10x36xf32>
    %166 = vector.broadcast %164 : vector<1x36xf32> to vector<10x36xf32>
    %167 = arith.mulf %165, %166 : vector<10x36xf32>
    %168 = vector.broadcast %162 : vector<10x1xf32> to vector<10x36xf32>
    %169 = arith.addf %168, %167 : vector<10x36xf32>
    %c0_91 = arith.constant 0 : index
    %c1_92 = arith.constant 1 : index
    %170 = vector.load %arg5[%c0_91, %c1_92] : memref<10x3xf32, #tpu.memory_space<vmem>>, vector<10x1xf32>
    %c28 = arith.constant 28 : index
    %c0_93 = arith.constant 0 : index
    %171 = vector.load %arg9[%c28, %c0_93] : memref<30x36xf32, #tpu.memory_space<vmem>>, vector<1x36xf32>
    %172 = vector.broadcast %170 : vector<10x1xf32> to vector<10x36xf32>
    %173 = vector.broadcast %171 : vector<1x36xf32> to vector<10x36xf32>
    %174 = arith.mulf %172, %173 : vector<10x36xf32>
    %175 = arith.addf %169, %174 : vector<10x36xf32>
    %c0_94 = arith.constant 0 : index
    %c2_95 = arith.constant 2 : index
    %176 = vector.load %arg5[%c0_94, %c2_95] : memref<10x3xf32, #tpu.memory_space<vmem>>, vector<10x1xf32>
    %c29 = arith.constant 29 : index
    %c0_96 = arith.constant 0 : index
    %177 = vector.load %arg9[%c29, %c0_96] : memref<30x36xf32, #tpu.memory_space<vmem>>, vector<1x36xf32>
    %178 = vector.broadcast %176 : vector<10x1xf32> to vector<10x36xf32>
    %179 = vector.broadcast %177 : vector<1x36xf32> to vector<10x36xf32>
    %180 = arith.mulf %178, %179 : vector<10x36xf32>
    %181 = arith.addf %175, %180 : vector<10x36xf32>
    %c0_97 = arith.constant 0 : index
    %c0_98 = arith.constant 0 : index
    %182 = vector.load %arg8[%c0_97, %c0_98] : memref<10x1xf32, #tpu.memory_space<vmem>>, vector<10x1xf32>
    %c0_99 = arith.constant 0 : index
    %c0_100 = arith.constant 0 : index
    %183 = vector.load %arg7[%c0_99, %c0_100] : memref<10x12xf32, #tpu.memory_space<vmem>>, vector<10x1xf32>
    %c3_101 = arith.constant 3 : index
    %c0_102 = arith.constant 0 : index
    %184 = vector.load %arg9[%c3_101, %c0_102] : memref<30x36xf32, #tpu.memory_space<vmem>>, vector<1x36xf32>
    %185 = vector.broadcast %183 : vector<10x1xf32> to vector<10x36xf32>
    %186 = vector.broadcast %184 : vector<1x36xf32> to vector<10x36xf32>
    %187 = arith.mulf %185, %186 : vector<10x36xf32>
    %188 = vector.broadcast %182 : vector<10x1xf32> to vector<10x36xf32>
    %189 = arith.addf %188, %187 : vector<10x36xf32>
    %c0_103 = arith.constant 0 : index
    %c1_104 = arith.constant 1 : index
    %190 = vector.load %arg7[%c0_103, %c1_104] : memref<10x12xf32, #tpu.memory_space<vmem>>, vector<10x1xf32>
    %c4_105 = arith.constant 4 : index
    %c0_106 = arith.constant 0 : index
    %191 = vector.load %arg9[%c4_105, %c0_106] : memref<30x36xf32, #tpu.memory_space<vmem>>, vector<1x36xf32>
    %192 = vector.broadcast %190 : vector<10x1xf32> to vector<10x36xf32>
    %193 = vector.broadcast %191 : vector<1x36xf32> to vector<10x36xf32>
    %194 = arith.mulf %192, %193 : vector<10x36xf32>
    %195 = arith.addf %189, %194 : vector<10x36xf32>
    %c0_107 = arith.constant 0 : index
    %c2_108 = arith.constant 2 : index
    %196 = vector.load %arg7[%c0_107, %c2_108] : memref<10x12xf32, #tpu.memory_space<vmem>>, vector<10x1xf32>
    %c5_109 = arith.constant 5 : index
    %c0_110 = arith.constant 0 : index
    %197 = vector.load %arg9[%c5_109, %c0_110] : memref<30x36xf32, #tpu.memory_space<vmem>>, vector<1x36xf32>
    %198 = vector.broadcast %196 : vector<10x1xf32> to vector<10x36xf32>
    %199 = vector.broadcast %197 : vector<1x36xf32> to vector<10x36xf32>
    %200 = arith.mulf %198, %199 : vector<10x36xf32>
    %201 = arith.addf %195, %200 : vector<10x36xf32>
    %c0_111 = arith.constant 0 : index
    %c3_112 = arith.constant 3 : index
    %202 = vector.load %arg7[%c0_111, %c3_112] : memref<10x12xf32, #tpu.memory_space<vmem>>, vector<10x1xf32>
    %c9_113 = arith.constant 9 : index
    %c0_114 = arith.constant 0 : index
    %203 = vector.load %arg9[%c9_113, %c0_114] : memref<30x36xf32, #tpu.memory_space<vmem>>, vector<1x36xf32>
    %204 = vector.broadcast %202 : vector<10x1xf32> to vector<10x36xf32>
    %205 = vector.broadcast %203 : vector<1x36xf32> to vector<10x36xf32>
    %206 = arith.mulf %204, %205 : vector<10x36xf32>
    %207 = arith.addf %201, %206 : vector<10x36xf32>
    %c0_115 = arith.constant 0 : index
    %c4_116 = arith.constant 4 : index
    %208 = vector.load %arg7[%c0_115, %c4_116] : memref<10x12xf32, #tpu.memory_space<vmem>>, vector<10x1xf32>
    %c10_117 = arith.constant 10 : index
    %c0_118 = arith.constant 0 : index
    %209 = vector.load %arg9[%c10_117, %c0_118] : memref<30x36xf32, #tpu.memory_space<vmem>>, vector<1x36xf32>
    %210 = vector.broadcast %208 : vector<10x1xf32> to vector<10x36xf32>
    %211 = vector.broadcast %209 : vector<1x36xf32> to vector<10x36xf32>
    %212 = arith.mulf %210, %211 : vector<10x36xf32>
    %213 = arith.addf %207, %212 : vector<10x36xf32>
    %c0_119 = arith.constant 0 : index
    %c5_120 = arith.constant 5 : index
    %214 = vector.load %arg7[%c0_119, %c5_120] : memref<10x12xf32, #tpu.memory_space<vmem>>, vector<10x1xf32>
    %c11_121 = arith.constant 11 : index
    %c0_122 = arith.constant 0 : index
    %215 = vector.load %arg9[%c11_121, %c0_122] : memref<30x36xf32, #tpu.memory_space<vmem>>, vector<1x36xf32>
    %216 = vector.broadcast %214 : vector<10x1xf32> to vector<10x36xf32>
    %217 = vector.broadcast %215 : vector<1x36xf32> to vector<10x36xf32>
    %218 = arith.mulf %216, %217 : vector<10x36xf32>
    %219 = arith.addf %213, %218 : vector<10x36xf32>
    %c0_123 = arith.constant 0 : index
    %c6_124 = arith.constant 6 : index
    %220 = vector.load %arg7[%c0_123, %c6_124] : memref<10x12xf32, #tpu.memory_space<vmem>>, vector<10x1xf32>
    %c15 = arith.constant 15 : index
    %c0_125 = arith.constant 0 : index
    %221 = vector.load %arg9[%c15, %c0_125] : memref<30x36xf32, #tpu.memory_space<vmem>>, vector<1x36xf32>
    %222 = vector.broadcast %220 : vector<10x1xf32> to vector<10x36xf32>
    %223 = vector.broadcast %221 : vector<1x36xf32> to vector<10x36xf32>
    %224 = arith.mulf %222, %223 : vector<10x36xf32>
    %225 = arith.addf %219, %224 : vector<10x36xf32>
    %c0_126 = arith.constant 0 : index
    %c7_127 = arith.constant 7 : index
    %226 = vector.load %arg7[%c0_126, %c7_127] : memref<10x12xf32, #tpu.memory_space<vmem>>, vector<10x1xf32>
    %c16 = arith.constant 16 : index
    %c0_128 = arith.constant 0 : index
    %227 = vector.load %arg9[%c16, %c0_128] : memref<30x36xf32, #tpu.memory_space<vmem>>, vector<1x36xf32>
    %228 = vector.broadcast %226 : vector<10x1xf32> to vector<10x36xf32>
    %229 = vector.broadcast %227 : vector<1x36xf32> to vector<10x36xf32>
    %230 = arith.mulf %228, %229 : vector<10x36xf32>
    %231 = arith.addf %225, %230 : vector<10x36xf32>
    %c0_129 = arith.constant 0 : index
    %c8_130 = arith.constant 8 : index
    %232 = vector.load %arg7[%c0_129, %c8_130] : memref<10x12xf32, #tpu.memory_space<vmem>>, vector<10x1xf32>
    %c17 = arith.constant 17 : index
    %c0_131 = arith.constant 0 : index
    %233 = vector.load %arg9[%c17, %c0_131] : memref<30x36xf32, #tpu.memory_space<vmem>>, vector<1x36xf32>
    %234 = vector.broadcast %232 : vector<10x1xf32> to vector<10x36xf32>
    %235 = vector.broadcast %233 : vector<1x36xf32> to vector<10x36xf32>
    %236 = arith.mulf %234, %235 : vector<10x36xf32>
    %237 = arith.addf %231, %236 : vector<10x36xf32>
    %c0_132 = arith.constant 0 : index
    %c9_133 = arith.constant 9 : index
    %238 = vector.load %arg7[%c0_132, %c9_133] : memref<10x12xf32, #tpu.memory_space<vmem>>, vector<10x1xf32>
    %c21 = arith.constant 21 : index
    %c0_134 = arith.constant 0 : index
    %239 = vector.load %arg9[%c21, %c0_134] : memref<30x36xf32, #tpu.memory_space<vmem>>, vector<1x36xf32>
    %240 = vector.broadcast %238 : vector<10x1xf32> to vector<10x36xf32>
    %241 = vector.broadcast %239 : vector<1x36xf32> to vector<10x36xf32>
    %242 = arith.mulf %240, %241 : vector<10x36xf32>
    %243 = arith.addf %237, %242 : vector<10x36xf32>
    %c0_135 = arith.constant 0 : index
    %c10_136 = arith.constant 10 : index
    %244 = vector.load %arg7[%c0_135, %c10_136] : memref<10x12xf32, #tpu.memory_space<vmem>>, vector<10x1xf32>
    %c22 = arith.constant 22 : index
    %c0_137 = arith.constant 0 : index
    %245 = vector.load %arg9[%c22, %c0_137] : memref<30x36xf32, #tpu.memory_space<vmem>>, vector<1x36xf32>
    %246 = vector.broadcast %244 : vector<10x1xf32> to vector<10x36xf32>
    %247 = vector.broadcast %245 : vector<1x36xf32> to vector<10x36xf32>
    %248 = arith.mulf %246, %247 : vector<10x36xf32>
    %249 = arith.addf %243, %248 : vector<10x36xf32>
    %c0_138 = arith.constant 0 : index
    %c11_139 = arith.constant 11 : index
    %250 = vector.load %arg7[%c0_138, %c11_139] : memref<10x12xf32, #tpu.memory_space<vmem>>, vector<10x1xf32>
    %c23 = arith.constant 23 : index
    %c0_140 = arith.constant 0 : index
    %251 = vector.load %arg9[%c23, %c0_140] : memref<30x36xf32, #tpu.memory_space<vmem>>, vector<1x36xf32>
    %252 = vector.broadcast %250 : vector<10x1xf32> to vector<10x36xf32>
    %253 = vector.broadcast %251 : vector<1x36xf32> to vector<10x36xf32>
    %254 = arith.mulf %252, %253 : vector<10x36xf32>
    %255 = arith.addf %249, %254 : vector<10x36xf32>
    %256 = arith.addf %161, %14 : vector<10x36xf32>
    %257 = arith.maximumf %14, %256 : vector<10x36xf32>
    %258 = arith.addf %181, %257 : vector<10x36xf32>
    %259 = arith.maximumf %257, %258 : vector<10x36xf32>
    %cst_141 = arith.constant 0.000000e+00 : f32
    %260 = vector.broadcast %cst_141 : f32 to vector<10x36xf32>
    %261 = arith.maximumf %259, %260 : vector<10x36xf32>
    %262 = arith.addf %255, %261 : vector<10x36xf32>
    %cst_142 = arith.constant 0.000000e+00 : f32
    %263 = vector.broadcast %cst_142 : f32 to vector<10x36xf32>
    %264 = arith.maximumf %262, %263 : vector<10x36xf32>
    %265 = arith.maximumf %259, %264 : vector<10x36xf32>
    %c1_143 = arith.constant 1 : index
    %c0_144 = arith.constant 0 : index
    %c0_145 = arith.constant 0 : index
    %266 = vector.load %arg10[%c1_143, %c0_144, %c0_145] : memref<2x10x36xf32, #tpu.memory_space<vmem>>, vector<1x10x36xf32>
    %267 = vector.shape_cast %266 : vector<1x10x36xf32> to vector<10x36xf32>
    %268 = vector.shape_cast %265 : vector<10x36xf32> to vector<1x10x36xf32>
    tpu.vector_store %arg10[%c1_143, %c0_144, %c0_145], %268 {strides = array<i32>} : memref<2x10x36xf32, #tpu.memory_space<vmem>>, vector<1x10x36xf32>,
    return
  }
}

</mosaic_0001>

<bundles_post_ra>
// kernel: forward.1
= control target key start
LH: loop header
LB: loop body
LE: loop exit
PB: predicated region body
PF: predicated region fallthrough
CT: control target
= control target key end

     0   :  { %v816_v0 = vmov 0   ;;  %v817_v5 = vmov 4   ;;  %s818_s25 = smov 127   ;;  %v819_v9 = vmov 1   ;;  %v820_v14 = vmov 2   ;;  %s1363_s4 = inlined_call_operand.vmem [shape: f32[10,1], index: 4, kind: input, shape index: {}]   ;;  %s1364_s3 = inlined_call_operand.vmem [shape: f32[10,3], index: 3, kind: input, shape index: {}]   ;;  %s1365_s0 = inlined_call_operand.vmem [shape: f32[1,2], index: 0, kind: input, shape index: {}]   ;;  %s1366_s1 = inlined_call_operand.vmem [shape: f32[10,2], index: 1, kind: input, shape index: {}]   ;;  %s1367_s9 = inlined_call_operand.vmem [shape: f32[30,36], index: 9, kind: input, shape index: {}]   ;;  %s1368_s5 = inlined_call_operand.vmem [shape: f32[10,3], index: 5, kind: input, shape index: {}]   ;;  %s1369_s7 = inlined_call_operand.vmem [shape: f32[10,12], index: 7, kind: input, shape index: {}]   ;;  %s1370_s6 = inlined_call_operand.vmem [shape: f32[10,1], index: 6, kind: input, shape index: {}]   ;;  %s1371_s8 = inlined_call_operand.vmem [shape: f32[10,1], index: 8, kind: input, shape index: {}]   ;;  %s1372_s2 = inlined_call_operand.vmem [shape: f32[10,1], index: 2, kind: input, shape index: {}]   ;;  %s1373_s10 = inlined_call_operand.vmem [shape: f32[2,10,36], index: 10, kind: output, shape index: {}]  }
   0x1   :  { %716 = vset.pattern.permute.xlu1 %v816_v0  ;;  %715 = vset.pattern.permute.xlu2 %v816_v0  ;;  %v70_v1 = vld [vmem:[%s1363_s4 + $0x8] sm:$0x3]  ;;  %v892_v2 = vld [vmem:[%s1364_s3] sm:$0xff]  ;;  %v821_v16 = vmov 7   ;;  %v822_v18 = vmov 9   ;;  %v823_v23 = vmov 3  }
   0x2   :  { %v35_v3 = vld [vmem:[%s1366_s1] sm:$0xff]  ;;  %94 = vperm.xlu1 %716, %v70_v1   ;;  %76 = vperm.xlu2 %715, %v892_v2   ;;  %v36_v7 = vld [vmem:[%s1366_s1 + $0x8] sm:$0x3]  ;;  %v824_v24 = vmov 5   ;;  %v825_v27 = vmov 6   ;;  %v826_v34 = vmov 8  }
   0x3   :  { %v785_v4 = vld [vmem:[%s1365_s0] ss:$0 sm:$0xff]  ;;  %733 = vset.pattern.permute.xlu0 %v817_v5  ;;  %v910_v8 = vld [vmem:[%s1364_s3 + $0x8] sm:$0x3]  ;;  %v1034_v39 = vld [vmem:[%s1367_s9 + $0x1] ss:$0 sm:$0xff] }
   0x4   :  { %v902_v6 = vmul.f32 %v785_v4, %v35_v3  ;;  %v915_v10 = vmul.f32 %v785_v4, %v36_v7  ;;  %v922_v11 = vld [vmem:[%s1368_s5] sm:$0xff]  ;;  %v930_v12 = vld [vmem:[%s1369_s7 + $0x8] sm:$0x3]  ;;  %v789_v49 = vld [vmem:[%s1367_s9 + $0x18] ss:$0 sm:$0xff]  ;;  %v827_v60 = vmov 10  }
   0x5   :  { %v127_v13 = vld [vmem:[%s1370_s6] sm:$0xff]  ;;  %v130_v17 = vld [vmem:[%s1368_s5 + $0x8] sm:$0x3]  ;;  %v1074_v1 = vld [vmem:[%s1367_s9 + $0x19] ss:$0 sm:$0xff]  ;;  %v828_v4 = vmov 11  }
   0x6   :  { %45 = vrot.lane.b32.xlu0 %v902_v6, %s818_s25  ;;  %v942_v15 = vld [vmem:[%s1369_s7] sm:$0xff]  ;;  %v128_v19 = vld [vmem:[%s1370_s6 + $0x8] sm:$0x3]  ;;  %vm381_vm0 = vcmask 287744   ;;  %vm379_vm1 = vcmask 293888  }
   0x7   :  { %v960_v20 = vld [vmem:[%s1363_s4] sm:$0xff]  ;;  %v186_v22 = vld [vmem:[%s1371_s8 + $0x8] sm:$0x3] }
   0x8   :  { %v967_v21 = vld [vmem:[%s1371_s8] sm:$0xff]  ;;  %v1000_v26 = vld [vmem:[%s1368_s5 + $0x8] sm:$0x3] }
   0x9   :  { %v1015_v29 = vld [vmem:[%s1367_s9] ss:$0 sm:$0xff]  ;;  %v54_v46 = vld [vmem:[%s1372_s2 + $0x8] sm:$0x3] }
   0xa   :  { %718 = vset.pattern.permute.xlu1 %v819_v9  ;;  %81 = vperm.xlu2 %715, %v910_v8   ;;  %v53_v36 = vld [vmem:[%s1372_s2] sm:$0xff]  ;;  %v1052_v50 = vld [vmem:[%s1364_s3 + $0x8] sm:$0x3] }
   0xb   :  { %105 = vperm.xlu1 %718, %v910_v8  }
   0xe   :  { %47 = vrot.lane.b32.xlu0 %v915_v10, %s818_s25 }
  0x12   :  { %717 = vset.pattern.permute.xlu2 %v819_v9 }
  0x13   :  { %720 = vset.pattern.permute.xlu1 %v816_v0  ;;  %101 = vperm.xlu2 %717, %v892_v2  }
  0x14   :  { %134 = vperm.xlu1 %720, %v922_v11  }
  0x16   :  { %257 = vperm.xlu0 %733, %v930_v12  }
  0x1b   :  { %719 = vset.pattern.permute.xlu2 %v820_v14 }
  0x1c   :  { %147 = vperm.xlu1 %720, %v127_v13   ;;  %115 = vperm.xlu2 %719, %v892_v2  }
  0x1e   :  { %738 = vset.pattern.permute.xlu0 %v821_v16 }
  0x1f   :  { %295 = vperm.xlu0 %738, %v942_v15  }
  0x24   :  { %722 = vset.pattern.permute.xlu1 %v819_v9  ;;  %721 = vset.pattern.permute.xlu2 %v816_v0 }
  0x25   :  { %163 = vperm.xlu1 %722, %v130_v17   ;;  %139 = vperm.xlu2 %721, %v130_v17  }
  0x27   :  { %743 = vset.pattern.permute.xlu0 %v822_v18 }
  0x28   :  { %327 = vperm.xlu0 %743, %v930_v12  }
  0x2d   :  { %724 = vset.pattern.permute.xlu1 %v820_v14  ;;  %152 = vperm.xlu2 %721, %v128_v19  }
  0x2e   :  { %177 = vperm.xlu1 %724, %v130_v17  }
  0x30   :  { %744 = vset.pattern.permute.xlu0 %v816_v0 }
  0x31   :  { %89 = vperm.xlu0 %744, %v960_v20  }
  0x35   :  { %723 = vset.pattern.permute.xlu2 %v820_v14 }
  0x36   :  { %726 = vset.pattern.permute.xlu1 %v816_v0  ;;  %173 = vperm.xlu2 %723, %v922_v11  }
  0x37   :  { %203 = vperm.xlu1 %726, %v967_v21  }
  0x39   :  { %196 = vperm.xlu0 %744, %v930_v12  }
  0x3e   :  { %725 = vset.pattern.permute.xlu2 %v816_v0 }
  0x3f   :  { %727 = vset.pattern.permute.xlu1 %v819_v9  ;;  %191 = vperm.xlu2 %725, %v942_v15  }
  0x40   :  { %214 = vperm.xlu1 %727, %v942_v15  }
  0x41   :  { %390 = vperm.xlu0 %744, %v892_v2  }
  0x47   :  { %208 = vperm.xlu2 %725, %v186_v22  }
  0x48   :  { %729 = vset.pattern.permute.xlu1 %v820_v14 }
  0x49   :  { %230 = vperm.xlu1 %729, %v930_v12   ;;  %461 = vperm.xlu0 %744, %v127_v13   ;;  %v1086_v13 = vld [vmem:[%s1367_s9 + $0x1a] ss:$0 sm:$0xff] }
  0x4f   :  { %728 = vset.pattern.permute.xlu2 %v819_v9 }
  0x50   :  { %218 = vperm.xlu2 %728, %v930_v12  }
  0x51   :  { %731 = vset.pattern.permute.xlu1 %v823_v23  ;;  %757 = vset.pattern.permute.xlu0 %v820_v14 }
  0x52   :  { %243 = vperm.xlu1 %731, %v930_v12   ;;  %119 = vperm.xlu0 %757, %v910_v8  }
  0x58   :  { %730 = vset.pattern.permute.xlu2 %v823_v23 }
  0x59   :  { %239 = vperm.xlu2 %730, %v942_v15  }
  0x5a   :  { %734 = vset.pattern.permute.xlu1 %v824_v24  ;;  %226 = vperm.xlu0 %757, %v942_v15  }
  0x5b   :  { %267 = vperm.xlu1 %734, %v942_v15  }
  0x5c   :  { %v995_v25 = vpop.permute.xlu2 %76 }
  0x5d   :  { %v85_v22 = vmul.f32 %v1015_v29, %v995_v25 }
  0x61   :  { %732 = vset.pattern.permute.xlu2 %v817_v5 }
  0x62   :  { %253 = vperm.xlu2 %732, %v942_v15   ;;  %491 = vperm.xlu0 %757, %v1000_v26  }
  0x63   :  { %736 = vset.pattern.permute.xlu1 %v825_v27 }
  0x64   :  { %281 = vperm.xlu1 %736, %v942_v15   ;;  %v82_v28 = vpop.permute.xlu2 %81 }
  0x65   :  { %v86_v31 = vmul.f32 %v1015_v29, %v82_v28  ;;  %v1099_v28 = vld [vmem:[%s1367_s9 + $0x2] ss:$0 sm:$0xff] }
  0x6a   :  { %735 = vset.pattern.permute.xlu2 %v824_v24  ;;  %761 = vset.pattern.permute.xlu0 %v819_v9 }
  0x6b   :  { %271 = vperm.xlu2 %735, %v930_v12   ;;  %159 = vperm.xlu0 %761, %v922_v11  }
  0x6c   :  { %739 = vset.pattern.permute.xlu1 %v821_v16 }
  0x6d   :  { %299 = vperm.xlu1 %739, %v930_v12   ;;  %v1018_v30 = vpop.permute.xlu2 %101 }
  0x73   :  { %737 = vset.pattern.permute.xlu2 %v825_v27  ;;  %419 = vperm.xlu0 %761, %v1052_v50  }
  0x74   :  { %v95_v32 = vpop.permute.xlu1 %94  ;;  %285 = vperm.xlu2 %737, %v930_v12  }
  0x75   :  { %v98_v33 = vadd.f32 %v95_v32, %v86_v31  ;;  %741 = vset.pattern.permute.xlu1 %v826_v34 }
  0x76   :  { %313 = vperm.xlu1 %741, %v930_v12   ;;  %v1025_v35 = vpop.permute.xlu2 %115 }
  0x78   :  { %v46_v37 = vpop.permute.xlu0 %45 }
  0x79   :  { %v51_v38 = vadd.f32 %v46_v37, %v902_v6 }
  0x7b   :  { %v55_v40 = vadd.f32 %v53_v36, %v51_v38  ;;  %528 = vperm.xlu0 %761, %v942_v15   ;;  %v384_v38 = vld [vmem:[%s1363_s4 + $0x8] sm:$0x3] }
  0x7c   :  { %740 = vset.pattern.permute.xlu2 %v826_v34 }
  0x7d   :  { %v57_v41 = vmax.f32 %v55_v40, 0.0  ;;  %v106_v42 = vpop.permute.xlu1 %105  ;;  %309 = vperm.xlu2 %740, %v942_v15  }
  0x7e   :  { %v110_v43 = vmul.f32 %v1034_v39, %v106_v42  ;;  %745 = vset.pattern.permute.xlu1 %v816_v0 }
  0x7f   :  { %61 = vperm.xlu1 %745, %v57_v41   ;;  %v140_v44 = vpop.permute.xlu2 %139 }
  0x80   :  { %v1040_v45 = vadd.f32 %v110_v43, %v98_v33  ;;  %v48_v47 = vpop.permute.xlu0 %47  ;;  %v144_v52 = vmul.f32 %v789_v49, %v140_v44  ;;  %v109_v33 = vmul.f32 %v1034_v39, %v1018_v30 }
  0x81   :  { %v52_v48 = vadd.f32 %v48_v47, %v915_v10 }
  0x83   :  { %v56_v51 = vadd.f32 %v54_v46, %v52_v48  ;;  %768 = vset.pattern.permute.xlu0 %v823_v23 }
  0x85   :  { %v58_v53 = vmax.f32 %v56_v51, 0.0  ;;  %742 = vset.pattern.permute.xlu2 %v822_v18 }
  0x86   :  { %v135_v54 = vpop.permute.xlu1 %134  ;;  %323 = vperm.xlu2 %742, %v942_v15  }
  0x87   :  { %66 = vperm.xlu1 %745, %v58_v53   ;;  %v153_v55 = vpop.permute.xlu2 %152  ;;  %v143_v58 = vmul.f32 %v789_v49, %v135_v54 }
  0x88   :  { %v1057_v56 = vpop.permute.xlu0 %257  ;;  %v156_v57 = vadd.f32 %v153_v55, %v144_v52  ;;  %v796_v55 = vld [vmem:[%s1367_s9 + $0x6] ss:$0 sm:$0xff] }
  0x8e   :  { %v148_v59 = vpop.permute.xlu1 %147  ;;  %747 = vset.pattern.permute.xlu2 %v827_v60 }
  0x8f   :  { %v1061_v61 = vadd.f32 %v148_v59, %v143_v58  ;;  %341 = vperm.xlu2 %747, %v930_v12   ;;  %746 = vset.pattern.permute.xlu1 %v827_v60  ;;  %v790_v58 = vld [vmem:[%s1367_s9 + $0x7] ss:$0 sm:$0xff] }
  0x90   :  { %337 = vperm.xlu1 %746, %v942_v15   ;;  %v1066_v62 = vpop.permute.xlu2 %173 }
  0x91   :  { %v1068_v63 = vpop.permute.xlu0 %295 }
  0x97   :  { %v164_v3 = vpop.permute.xlu1 %163  ;;  %749 = vset.pattern.permute.xlu2 %v828_v4 }
  0x98   :  { %v168_v6 = vmul.f32 %v1074_v1, %v164_v3  ;;  %355 = vperm.xlu2 %749, %v930_v12   ;;  %748 = vset.pattern.permute.xlu1 %v828_v4 }
  0x99   :  { %351 = vperm.xlu1 %748, %v942_v15   ;;  %v192_v7 = vpop.permute.xlu2 %191 }
  0x9a   :  { %v170_v8 = vadd.f32 %v168_v6, %v156_v57  ;;  %v1081_v10 = vpop.permute.xlu0 %327  ;;  %v199_v37 = vmul.f32 %v1015_v29, %v192_v7 }
  0xa0   :  { %v178_v17 = vpop.permute.xlu1 %177  ;;  %751 = vset.pattern.permute.xlu2 %v816_v0 }
  0xa1   :  { %v182_v19 = vmul.f32 %v1086_v13, %v178_v17  ;;  %750 = vset.pattern.permute.xlu1 %v816_v0  ;;  %v1091_v12 = vpop.permute.xlu2 %208  ;;  %403 = vperm.xlu2 %751, %v960_v20   ;;  %v123_v20 = vmul.f32 %v1099_v28, %v1025_v35 }
  0xa2   :  { %395 = vperm.xlu1 %750, %v1052_v50  }
  0xa3   :  { %v1102_v31 = vadd.f32 %v182_v19, %v170_v8  ;;  %v90_v32 = vpop.permute.xlu0 %89 }
  0xa4   :  { %v97_v36 = vadd.f32 %v90_v32, %v85_v22  ;;  %v791_v32 = vld [vmem:[%s1367_s9 + $0xd] ss:$0 sm:$0xff] }
  0xa6   :  { %v111_v25 = vadd.f32 %v109_v33, %v97_v36  ;;  %v797_v33 = vld [vmem:[%s1367_s9 + $0x8] ss:$0 sm:$0xff] }
  0xa8   :  { %v1112_v40 = vadd.f32 %v123_v20, %v111_v25  ;;  %v798_v20 = vld [vmem:[%s1367_s9 + $0xc] ss:$0 sm:$0xff]  ;;  %v303_v25 = vmul.f32 %v791_v32, %v1068_v63 }
  0xa9   :  { %v204_v41 = vpop.permute.xlu1 %203  ;;  %752 = vset.pattern.permute.xlu2 %v819_v9 }
  0xaa   :  { %v211_v42 = vadd.f32 %v204_v41, %v199_v37  ;;  %408 = vperm.xlu1 %750, %v384_v38   ;;  %v1115_v43 = vpop.permute.xlu2 %218  ;;  %415 = vperm.xlu2 %752, %v892_v2  }
  0xab   :  { %v1118_v30 = vpop.permute.xlu0 %196 }
  0xac   :  { %v200_v63 = vmul.f32 %v1015_v29, %v1118_v30 }
  0xb2   :  { %v215_v35 = vpop.permute.xlu1 %214  ;;  %753 = vset.pattern.permute.xlu1 %v820_v14  ;;  %754 = vset.pattern.permute.xlu2 %v820_v14 }
  0xb3   :  { %429 = vperm.xlu1 %753, %v892_v2   ;;  %v1123_v44 = vpop.permute.xlu0 %390  ;;  %v240_v46 = vpop.permute.xlu2 %239  ;;  %433 = vperm.xlu2 %754, %v1052_v50   ;;  %v1137_v2 = vld [vmem:[%s1369_s7 + $0x8] sm:$0x3]  ;;  %v221_v54 = vmul.f32 %v1034_v39, %v215_v35 }
  0xb4   :  { %v442_v50 = vld [vmem:[%s1370_s6 + $0x8] sm:$0x3]  ;;  %557 = vperm.xlu0 %768, %v1137_v2   ;;  %v247_v3 = vmul.f32 %v796_v55, %v240_v46 }
  0xb5   :  { %v223_v59 = vadd.f32 %v221_v54, %v211_v42 }
  0xbb   :  { %v1126_v47 = vpop.permute.xlu1 %230  ;;  %755 = vset.pattern.permute.xlu1 %v816_v0  ;;  %v1129_v48 = vpop.permute.xlu0 %461  ;;  %756 = vset.pattern.permute.xlu2 %v816_v0 }
  0xbc   :  { %448 = vperm.xlu1 %755, %v922_v11   ;;  %v254_v49 = vpop.permute.xlu2 %253  ;;  %453 = vperm.xlu2 %756, %v1000_v26   ;;  %v234_v29 = vmul.f32 %v1099_v28, %v1126_v47 }
  0xbd   :  { %773 = vset.pattern.permute.xlu0 %v825_v27  ;;  %v261_v8 = vmul.f32 %v790_v58, %v254_v49  ;;  %v500_v49 = vld [vmem:[%s1371_s8 + $0x8] sm:$0x3] }
  0xbe   :  { %595 = vperm.xlu0 %773, %v942_v15  }
  0xc4   :  { %v244_v51 = vpop.permute.xlu1 %243  ;;  %466 = vperm.xlu1 %755, %v442_v50   ;;  %v1143_v52 = vpop.permute.xlu0 %119  ;;  %758 = vset.pattern.permute.xlu2 %v819_v9 }
  0xc5   :  { %v1146_v53 = vpop.permute.xlu2 %271  ;;  %473 = vperm.xlu2 %758, %v922_v11  }
  0xc6   :  { %778 = vset.pattern.permute.xlu0 %v826_v34  ;;  %v276_v30 = vmul.f32 %v797_v33, %v1146_v53 }
  0xc7   :  { %627 = vperm.xlu0 %778, %v1137_v2  }
  0xcc   :  { %759 = vset.pattern.permute.xlu1 %v819_v9  ;;  %v227_v57 = vpop.permute.xlu0 %226 }
  0xcd   :  { %v233_v6 = vmul.f32 %v1099_v28, %v227_v57  ;;  %v268_v7 = vpop.permute.xlu1 %267  ;;  %477 = vperm.xlu1 %759, %v1000_v26   ;;  %760 = vset.pattern.permute.xlu2 %v820_v14  ;;  %v181_v57 = vmul.f32 %v1086_v13, %v1066_v62 }
  0xce   :  { %487 = vperm.xlu2 %760, %v922_v11   ;;  %v286_v19 = vpop.permute.xlu2 %285  ;;  %v275_v11 = vmul.f32 %v797_v33, %v268_v7  ;;  %v222_v7 = vmul.f32 %v1034_v39, %v1115_v43  ;;  %v1230_v33 = vld [vmem:[%s1367_s9 + $0x3] ss:$0 sm:$0xff] }
  0xcf   :  { %v235_v17 = vadd.f32 %v233_v6, %v223_v59  ;;  %783 = vset.pattern.permute.xlu0 %v828_v4  ;;  %v212_v6 = vadd.f32 %v1091_v12, %v200_v63  ;;  %v262_v12 = vmul.f32 %v790_v58, %v1057_v56  ;;  %v290_v47 = vmul.f32 %v798_v20, %v286_v19  ;;  %v800_v56 = vld [vmem:[%s1367_s9 + $0xe] ss:$0 sm:$0xff] }
  0xd0   :  { %665 = vperm.xlu0 %783, %v942_v15  }
  0xd1   :  { %v249_v22 = vadd.f32 %v247_v3, %v235_v17 }
  0xd3   :  { %v263_v36 = vadd.f32 %v261_v8, %v249_v22  ;;  %v794_v22 = vld [vmem:[%s1367_s9 + $0x12] ss:$0 sm:$0xff] }
  0xd4   :  { %v1171_v26 = vpop.permute.xlu0 %491 }
  0xd5   :  { %762 = vset.pattern.permute.xlu1 %v816_v0  ;;  %v277_v38 = vadd.f32 %v275_v11, %v263_v36 }
  0xd6   :  { %v282_v37 = vpop.permute.xlu1 %281  ;;  %505 = vperm.xlu1 %762, %v942_v15   ;;  %763 = vset.pattern.permute.xlu2 %v816_v0 }
  0xd7   :  { %v289_v41 = vmul.f32 %v798_v20, %v282_v37  ;;  %v1180_v42 = vpop.permute.xlu2 %309  ;;  %510 = vperm.xlu2 %763, %v1137_v2   ;;  %v801_v20 = vld [vmem:[%s1367_s9 + $0x13] ss:$0 sm:$0xff] }
  0xd9   :  { %v291_v35 = vadd.f32 %v289_v41, %v277_v38 }
  0xdb   :  { %v1183_v46 = vadd.f32 %v303_v25, %v291_v35 }
  0xdd   :  { %v160_v0 = vpop.permute.xlu0 %159 }
  0xde   :  { %v167_v50 = vmul.f32 %v1074_v1, %v160_v0  ;;  %517 = vperm.xlu1 %762, %v967_v21   ;;  %v224_v1 = vadd.f32 %v222_v7, %v212_v6  ;;  %v248_v21 = vmul.f32 %v796_v55, %v244_v51 }
  0xdf   :  { %v300_v54 = vpop.permute.xlu1 %299  ;;  %522 = vperm.xlu2 %763, %v500_v49  }
  0xe0   :  { %v169_v59 = vadd.f32 %v167_v50, %v1061_v61  ;;  %v1197_v3 = vpop.permute.xlu2 %323  ;;  %v236_v61 = vadd.f32 %v234_v29, %v224_v1  ;;  %v304_v55 = vmul.f32 %v791_v32, %v300_v54 }
  0xe1   :  { %v331_v1 = vmul.f32 %v794_v22, %v1197_v3 }
  0xe2   :  { %v183_v8 = vadd.f32 %v181_v57, %v169_v59  ;;  %v250_v39 = vadd.f32 %v248_v21, %v236_v61 }
  0xe4   :  { %v264_v43 = vadd.f32 %v262_v12, %v250_v39 }
  0xe6   :  { %764 = vset.pattern.permute.xlu1 %v819_v9  ;;  %v278_v51 = vadd.f32 %v276_v30, %v264_v43 }
  0xe7   :  { %532 = vperm.xlu1 %764, %v1137_v2   ;;  %765 = vset.pattern.permute.xlu2 %v820_v14 }
  0xe8   :  { %v314_v62 = vpop.permute.xlu1 %313  ;;  %540 = vperm.xlu2 %765, %v942_v15   ;;  %v292_v17 = vadd.f32 %v290_v47, %v278_v51 }
  0xe9   :  { %v342_v13 = vpop.permute.xlu2 %341  ;;  %v318_v19 = vmul.f32 %v800_v56, %v314_v62 }
  0xea   :  { %v306_v32 = vadd.f32 %v304_v55, %v292_v17  ;;  %v346_v41 = vmul.f32 %v801_v20, %v342_v13  ;;  %v420_v55 = vpop.permute.xlu0 %419 }
  0xec   :  { %v320_v11 = vadd.f32 %v318_v19, %v306_v32 }
  0xef   :  { %766 = vset.pattern.permute.xlu1 %v820_v14  ;;  %v124_v14 = vmul.f32 %v1099_v28, %v1143_v52  ;;  %v399_v28 = vmul.f32 %v1230_v33, %v1123_v44 }
  0xf0   :  { %544 = vperm.xlu1 %766, %v1137_v2   ;;  %767 = vset.pattern.permute.xlu2 %v823_v23 }
  0xf1   :  { %v1213_v9 = vpop.permute.xlu1 %61  ;;  %553 = vperm.xlu2 %767, %v942_v15   ;;  %v126_v52 = vadd.f32 %v124_v14, %v1040_v45 }
  0xf2   :  { %v363_v53 = vadd.f32 %v1112_v40, %v1213_v9  ;;  %v356_v58 = vpop.permute.xlu2 %355  ;;  %v332_v40 = vmul.f32 %v794_v22, %v1081_v10  ;;  %v802_v10 = vld [vmem:[%s1367_s9 + $0x14] ss:$0 sm:$0xff] }
  0xf3   :  { %v360_v0 = vmul.f32 %v802_v10, %v356_v58 }
  0xf4   :  { %v365_v23 = vmax.f32 %v1213_v9, %v363_v53  ;;  %v334_v38 = vadd.f32 %v332_v40, %v320_v11  ;;  %v1283_v53 = vld [vmem:[%s1367_s9 + $0x5] ss:$0 sm:$0xff] }
  0xf6   :  { %v367_v36 = vadd.f32 %v365_v23, %v183_v8  ;;  %v348_v50 = vadd.f32 %v346_v41, %v334_v38 }
  0xf8   :  { %v369_v37 = vmax.f32 %v365_v23, %v367_v36  ;;  %769 = vset.pattern.permute.xlu1 %v817_v5  ;;  %v362_v57 = vadd.f32 %v360_v0, %v348_v50 }
  0xf9   :  { %567 = vperm.xlu1 %769, %v942_v15   ;;  %v1241_v25 = vpop.permute.xlu1 %66  ;;  %770 = vset.pattern.permute.xlu2 %v817_v5  ;;  %v1255_v5 = vld [vmem:[%s1367_s9 + $0x4] ss:$0 sm:$0xff] }
  0xfa   :  { %v364_v45 = vadd.f32 %v126_v52, %v1241_v25  ;;  %571 = vperm.xlu2 %770, %v1137_v2   ;;  %v371_v43 = vmax.f32 %v369_v37, 0.0  ;;  %v424_v14 = vmul.f32 %v1255_v5, %v420_v55  ;;  %v807_v55 = vld [vmem:[%s1367_s9 + $0x9] ss:$0 sm:$0xff] }
  0xfb   :  { %v404_v44 = vpop.permute.xlu2 %403 }
  0xfc   :  { %v366_v35 = vmax.f32 %v1241_v25, %v364_v45  ;;  %v411_v49 = vadd.f32 %v404_v44, %v399_v28 }
  0xfe   :  { %v368_v63 = vadd.f32 %v366_v35, %v1102_v31  ;;  %v317_v31 = vmul.f32 %v800_v56, %v1180_v42 }
 0x100   :  { %v370_v54 = vmax.f32 %v366_v35, %v368_v63  ;;  %v319_v62 = vadd.f32 %v317_v31, %v1183_v46 }
 0x101   :  { %771 = vset.pattern.permute.xlu1 %v824_v24 }
 0x102   :  { %v372_v59 = vmax.f32 %v370_v54, 0.0  ;;  %581 = vperm.xlu1 %771, %v942_v15   ;;  %v338_v6 = vpop.permute.xlu1 %337  ;;  %772 = vset.pattern.permute.xlu2 %v824_v24  ;;  %v333_v39 = vadd.f32 %v331_v1, %v319_v62 }
 0x103   :  { %585 = vperm.xlu2 %772, %v1137_v2   ;;  %v345_v12 = vmul.f32 %v801_v20, %v338_v6  ;;  %v805_v20 = vld [vmem:[%s1367_s9 + $0x1b] ss:$0 sm:$0xff] }
 0x104   :  { %v374_v7 = vadd.f32 %v372_v59, %v362_v57  ;;  %v416_v8 = vpop.permute.xlu2 %415 }
 0x105   :  { %v423_v29 = vmul.f32 %v1255_v5, %v416_v8  ;;  %v347_v42 = vadd.f32 %v345_v12, %v333_v39 }
 0x106   :  { %v376_v21 = vmax.f32 %v374_v7, 0.0 }
 0x107   :  { %v425_v61 = vadd.f32 %v423_v29, %v411_v49 }
 0x108   :  { %v378_v13 = vmax.f32 %v370_v54, %v376_v21 }
 0x10a   :  { %774 = vset.pattern.permute.xlu1 %v825_v27  ;;  %382 = vst.msk [vmem:[%s1373_s10 + $0x8] sm:$0x3] %vm381_vm0, %v378_v13 }
 0x10b   :  { %599 = vperm.xlu1 %774, %v1137_v2   ;;  %v352_v24 = vpop.permute.xlu1 %351  ;;  %775 = vset.pattern.permute.xlu2 %v821_v16 }
 0x10c   :  { %v359_v3 = vmul.f32 %v802_v10, %v352_v24  ;;  %609 = vperm.xlu2 %775, %v942_v15  }
 0x10d   :  { %v434_v47 = vpop.permute.xlu2 %433 }
 0x10e   :  { %v361_v46 = vadd.f32 %v359_v3, %v347_v42  ;;  %v438_v17 = vmul.f32 %v1283_v53, %v434_v47  ;;  %v529_v42 = vpop.permute.xlu0 %528 }
 0x110   :  { %v373_v30 = vadd.f32 %v371_v43, %v361_v46  ;;  %v535_v43 = vmul.f32 %v1255_v5, %v529_v42 }
 0x112   :  { %v375_v51 = vmax.f32 %v373_v30, 0.0 }
 0x113   :  { %776 = vset.pattern.permute.xlu1 %v821_v16 }
 0x114   :  { %v377_v27 = vmax.f32 %v369_v37, %v375_v51  ;;  %613 = vperm.xlu1 %776, %v1137_v2   ;;  %v396_v56 = vpop.permute.xlu1 %395  ;;  %777 = vset.pattern.permute.xlu2 %v826_v34  ;;  %v806_v37 = vld [vmem:[%s1367_s9 + $0x1c] ss:$0 sm:$0xff] }
 0x115   :  { %623 = vperm.xlu2 %777, %v942_v15   ;;  %v400_v58 = vmul.f32 %v1230_v33, %v396_v56 }
 0x116   :  { %380 = vst.msk [vmem:[%s1373_s10] sm:$0xff] %vm379_vm1, %v377_v27  ;;  %v454_v16 = vpop.permute.xlu2 %453 }
 0x117   :  { %v458_v35 = vmul.f32 %v805_v20, %v454_v16 }
 0x11c   :  { %779 = vset.pattern.permute.xlu1 %v822_v18  ;;  %v409_v34 = vpop.permute.xlu1 %408 }
 0x11d   :  { %v412_v19 = vadd.f32 %v409_v34, %v400_v58  ;;  %637 = vperm.xlu1 %779, %v942_v15   ;;  %780 = vset.pattern.permute.xlu2 %v822_v18 }
 0x11e   :  { %641 = vperm.xlu2 %780, %v1137_v2  }
 0x11f   :  { %v426_v23 = vadd.f32 %v424_v14, %v412_v19  ;;  %v474_v36 = vpop.permute.xlu2 %473 }
 0x120   :  { %v481_v45 = vmul.f32 %v806_v37, %v474_v36 }
 0x121   :  { %v440_v22 = vadd.f32 %v438_v17, %v426_v23 }
 0x123   :  { %v678_v32 = vadd.f32 %v440_v22, %v1241_v25  ;;  %v809_v22 = vld [vmem:[%s1367_s9 + $0xb] ss:$0 sm:$0xff] }
 0x125   :  { %781 = vset.pattern.permute.xlu1 %v827_v60  ;;  %v430_v40 = vpop.permute.xlu1 %429  ;;  %v680_v28 = vmax.f32 %v1241_v25, %v678_v32 }
 0x126   :  { %v437_v52 = vmul.f32 %v1283_v53, %v430_v40  ;;  %651 = vperm.xlu1 %781, %v942_v15   ;;  %782 = vset.pattern.permute.xlu2 %v827_v60  ;;  %v799_v15 = vld [vmem:[%s1367_s9 + $0x1d] ss:$0 sm:$0xff]  ;;  %v558_v51 = vpop.permute.xlu0 %557 }
 0x127   :  { %655 = vperm.xlu2 %782, %v1137_v2   ;;  %v562_v40 = vmul.f32 %v807_v55, %v558_v51 }
 0x128   :  { %v439_v18 = vadd.f32 %v437_v52, %v425_v61  ;;  %v488_v10 = vpop.permute.xlu2 %487 }
 0x129   :  { %v495_v41 = vmul.f32 %v799_v15, %v488_v10 }
 0x12a   :  { %v677_v11 = vadd.f32 %v439_v18, %v1213_v9 }
 0x12c   :  { %v679_v25 = vmax.f32 %v1213_v9, %v677_v11 }
 0x12e   :  { %784 = vset.pattern.permute.xlu1 %v828_v4  ;;  %v449_v60 = vpop.permute.xlu1 %448  ;;  %v496_v4 = vmul.f32 %v799_v15, %v1171_v26  ;;  %v810_v15 = vld [vmem:[%s1367_s9 + $0x10] ss:$0 sm:$0xff] }
 0x12f   :  { %v457_v44 = vmul.f32 %v805_v20, %v449_v60  ;;  %669 = vperm.xlu1 %784, %v1137_v2  }
 0x131   :  { %v469_v38 = vadd.f32 %v1129_v48, %v457_v44  ;;  %v511_v8 = vpop.permute.xlu2 %510 }
 0x132   :  { %v514_v47 = vmul.f32 %v1230_v33, %v511_v8  ;;  %v815_v8 = vld [vmem:[%s1367_s9 + $0x17] ss:$0 sm:$0xff] }
 0x133   :  { %v483_v49 = vadd.f32 %v481_v45, %v469_v38 }
 0x135   :  { %v497_v0 = vadd.f32 %v495_v41, %v483_v49  ;;  %v812_v49 = vld [vmem:[%s1367_s9 + $0x11] ss:$0 sm:$0xff] }
 0x136   :  { %v467_v63 = vpop.permute.xlu1 %466 }
 0x137   :  { %v681_v9 = vadd.f32 %v679_v25, %v497_v0  ;;  %v470_v50 = vadd.f32 %v467_v63, %v458_v35 }
 0x139   :  { %v1313_v54 = vmax.f32 %v679_v25, %v681_v9  ;;  %v523_v1 = vpop.permute.xlu2 %522 }
 0x13a   :  { %v526_v14 = vadd.f32 %v523_v1, %v514_v47 }
 0x13f   :  { %v478_v57 = vpop.permute.xlu1 %477 }
 0x140   :  { %v482_v59 = vmul.f32 %v806_v37, %v478_v57 }
 0x142   :  { %v484_v6 = vadd.f32 %v482_v59, %v470_v50  ;;  %v541_v61 = vpop.permute.xlu2 %540 }
 0x143   :  { %v547_v27 = vmul.f32 %v1283_v53, %v541_v61  ;;  %v814_v61 = vld [vmem:[%s1367_s9 + $0x16] ss:$0 sm:$0xff] }
 0x144   :  { %v498_v31 = vadd.f32 %v496_v4, %v484_v6  ;;  %v813_v6 = vld [vmem:[%s1367_s9 + $0x15] ss:$0 sm:$0xff] }
 0x146   :  { %v682_v7 = vadd.f32 %v680_v28, %v498_v31 }
 0x148   :  { %v506_v2 = vpop.permute.xlu1 %505  ;;  %v1316_v29 = vmax.f32 %v680_v28, %v682_v7  ;;  %v596_v28 = vpop.permute.xlu0 %595 }
 0x149   :  { %v513_v26 = vmul.f32 %v1230_v33, %v506_v2  ;;  %v808_v33 = vld [vmem:[%s1367_s9 + $0xa] ss:$0 sm:$0xff] }
 0x14b   :  { %v554_v13 = vpop.permute.xlu2 %553 }
 0x14c   :  { %v561_v19 = vmul.f32 %v807_v55, %v554_v13 }
 0x150   :  { %v518_v48 = vpop.permute.xlu1 %517  ;;  %v628_v38 = vpop.permute.xlu0 %627 }
 0x151   :  { %v525_v46 = vadd.f32 %v518_v48, %v513_v26  ;;  %v632_v48 = vmul.f32 %v812_v49, %v628_v38 }
 0x153   :  { %v537_v56 = vadd.f32 %v535_v43, %v525_v46  ;;  %v685_v46 = vmax.f32 %v1313_v54, 0.0 }
 0x154   :  { %v572_v39 = vpop.permute.xlu2 %571 }
 0x155   :  { %v549_v17 = vadd.f32 %v547_v27, %v537_v56  ;;  %v576_v37 = vmul.f32 %v808_v33, %v572_v39 }
 0x158   :  { %v666_v1 = vpop.permute.xlu0 %665 }
 0x159   :  { %v533_v21 = vpop.permute.xlu1 %532  ;;  %v673_v39 = vmul.f32 %v815_v8, %v666_v1 }
 0x15a   :  { %v536_v58 = vmul.f32 %v1255_v5, %v533_v21  ;;  %v563_v5 = vadd.f32 %v561_v19, %v549_v17 }
 0x15c   :  { %v538_v23 = vadd.f32 %v536_v58, %v526_v14 }
 0x15d   :  { %v586_v3 = vpop.permute.xlu2 %585 }
 0x15e   :  { %v590_v44 = vmul.f32 %v809_v22, %v586_v3 }
 0x162   :  { %v545_v62 = vpop.permute.xlu1 %544 }
 0x163   :  { %v548_v34 = vmul.f32 %v1283_v53, %v545_v62  ;;  %v811_v53 = vld [vmem:[%s1367_s9 + $0xf] ss:$0 sm:$0xff] }
 0x164   :  { %v603_v10 = vmul.f32 %v811_v53, %v596_v28 }
 0x165   :  { %v550_v36 = vadd.f32 %v548_v34, %v538_v23  ;;  %v686_v34 = vmax.f32 %v1316_v29, 0.0 }
 0x166   :  { %v610_v16 = vpop.permute.xlu2 %609 }
 0x167   :  { %v564_v25 = vadd.f32 %v562_v40, %v550_v36  ;;  %v617_v41 = vmul.f32 %v810_v15, %v610_v16 }
 0x169   :  { %v578_v45 = vadd.f32 %v576_v37, %v564_v25 }
 0x16b   :  { %v568_v12 = vpop.permute.xlu1 %567  ;;  %v592_v50 = vadd.f32 %v590_v44, %v578_v45 }
 0x16c   :  { %v575_v32 = vmul.f32 %v808_v33, %v568_v12 }
 0x16e   :  { %v577_v11 = vadd.f32 %v575_v32, %v563_v5 }
 0x16f   :  { %v624_v20 = vpop.permute.xlu2 %623 }
 0x170   :  { %v631_v59 = vmul.f32 %v812_v49, %v624_v20 }
 0x174   :  { %v582_v24 = vpop.permute.xlu1 %581 }
 0x175   :  { %v589_v18 = vmul.f32 %v809_v22, %v582_v24 }
 0x177   :  { %v591_v60 = vadd.f32 %v589_v18, %v577_v11 }
 0x178   :  { %v642_v9 = vpop.permute.xlu2 %641 }
 0x179   :  { %v605_v35 = vadd.f32 %v603_v10, %v591_v60  ;;  %v646_v24 = vmul.f32 %v813_v6, %v642_v9 }
 0x17b   :  { %v619_v4 = vadd.f32 %v617_v41, %v605_v35 }
 0x17d   :  { %v600_v30 = vpop.permute.xlu1 %599  ;;  %v633_v21 = vadd.f32 %v631_v59, %v619_v4 }
 0x17e   :  { %v604_v63 = vmul.f32 %v811_v53, %v600_v30 }
 0x180   :  { %v606_v31 = vadd.f32 %v604_v63, %v592_v50 }
 0x181   :  { %v656_v3 = vpop.permute.xlu2 %655 }
 0x182   :  { %v660_v47 = vmul.f32 %v814_v61, %v656_v3 }
 0x186   :  { %v614_v52 = vpop.permute.xlu1 %613 }
 0x187   :  { %v618_v57 = vmul.f32 %v810_v15, %v614_v52 }
 0x189   :  { %v620_v2 = vadd.f32 %v618_v57, %v606_v31 }
 0x18b   :  { %v634_v42 = vadd.f32 %v632_v48, %v620_v2 }
 0x18d   :  { %v648_v30 = vadd.f32 %v646_v24, %v634_v42 }
 0x18f   :  { %v638_v0 = vpop.permute.xlu1 %637  ;;  %v662_v55 = vadd.f32 %v660_v47, %v648_v30 }
 0x190   :  { %v645_v7 = vmul.f32 %v813_v6, %v638_v0 }
 0x192   :  { %v647_v13 = vadd.f32 %v645_v7, %v633_v21 }
 0x198   :  { %v652_v62 = vpop.permute.xlu1 %651 }
 0x199   :  { %v659_v12 = vmul.f32 %v814_v61, %v652_v62 }
 0x19b   :  { %v661_v26 = vadd.f32 %v659_v12, %v647_v13 }
 0x19d   :  { %v675_v43 = vadd.f32 %v673_v39, %v661_v26 }
 0x19f   :  { %v687_v51 = vadd.f32 %v685_v46, %v675_v43 }
 0x1a1   :  { %v689_v27 = vmax.f32 %v687_v51, 0.0  ;;  %v670_v56 = vpop.permute.xlu1 %669 }
 0x1a2   :  { %v674_v16 = vmul.f32 %v815_v8, %v670_v56 }
 0x1a3   :  { %v691_v58 = vmax.f32 %v1313_v54, %v689_v27 }
 0x1a4   :  { %v676_v14 = vadd.f32 %v674_v16, %v662_v55 }
 0x1a5   :  { %700 = vst.msk [vmem:[%s1373_s10 + $0x10] sm:$0xff] %vm379_vm1, %v691_v58 }
 0x1a6   :  { %v688_v17 = vadd.f32 %v686_v34, %v676_v14 }
 0x1a8   :  { %v690_v19 = vmax.f32 %v688_v17, 0.0 }
 0x1aa   :  { %v692_v33 = vmax.f32 %v1316_v29, %v690_v19 }
 0x1ac   :  { %701 = vst.msk [vmem:[%s1373_s10 + $0x18] sm:$0x3] %vm381_vm0, %v692_v33 }

</bundles_post_ra>
